<compile_context>
chip_gen: v7x
topology: tpu7x:2x2x1
jax: 0.10.0
libtpu: 0.0.40
codegen_flags: <defaults>
</compile_context>

<pallas_src>
import jax
import jax.numpy as jnp
from jax.experimental import pallas as pl
from jax.experimental.pallas import tpu as pltpu


def _make_tsm_conv_kernel(two_fold: int):
    def kernel(x_ref, w_ref, b_ref, o_ref, carry_ref, staged_ref):
        # x_ref     : (1, 1, C,   HWt)  full-channel tile of timestep t = T-1-t_rev
        # w_ref     : (Cout, C)         1x1-conv weight (resident across the grid)
        # b_ref     : (Cout, 1)         bias, f32 (resident)
        # o_ref     : (1, 1, Cout, HWt)
        # carry_ref : (2f, HWt) VMEM    leading channels of timestep t+1 (carried)
        # staged_ref: (C,  HWt) VMEM    temporally-shifted operand for the matmul
        t_rev = pl.program_id(2)

        @pl.when(t_rev == 0)            # actual t == T-1: shifted-in channels are zero
        def _():
            carry_ref[...] = jnp.zeros_like(carry_ref)

        # Build shifted operand: rows [2f:] from this timestep, rows [:2f] from t+1.
        staged_ref[...] = x_ref[0, 0]
        staged_ref[pl.ds(0, two_fold), :] = carry_ref[...]
        # Save this timestep's leading channels for the next (earlier) timestep.
        carry_ref[...] = x_ref[0, 0, pl.ds(0, two_fold), :]

        # 1x1 conv == one full-K matmul on the MXU, f32 accumulation.
        y = jnp.dot(w_ref[...], staged_ref[...], preferred_element_type=jnp.float32)
        o_ref[0, 0] = (y + b_ref[...]).astype(o_ref.dtype)

    return kernel


def _vmem_capacity_bytes():
    try:
        return int(pltpu.get_tpu_info().vmem_capacity_bytes)
    except Exception:
        return 64 * 2 ** 20            # conservative fallback: v7x per-TC VMEM


def _pick_hw_tile(hw, bytes_per_lane, lane_budget_bytes):
    """Lane-dense HW tile. If the whole HW fits the budget, use one full-width block
    (legal even when hw % 128 != 0 because it equals the full array dim). Otherwise
    use a multiple-of-128 tile with a cdiv grid; Pallas write-masks the tail block."""
    cap = max(128, (lane_budget_bytes // max(1, bytes_per_lane)) // 128 * 128)
    if hw <= cap:
        return hw
    if hw % 128 == 0:
        # Prefer an exact divisor near the cap so there is no masked tail block,
        # but never collapse below cap // 2 just to find a divisor.
        t = cap
        while t >= max(128, cap // 2):
            if hw % t == 0:
                return t
            t -= 128
    return cap


def temporal_shift_conv1x1(x_nchw, weight, bias, *, n_segment=3, fold_div=8,
                           use_bf16=False, out_dtype=None):
    """TemporalShift.shift (non-inplace) followed by the wrapped 1x1 conv `net`.

    x_nchw: (nt, c, h, w) float; weight: (c_out, c, 1, 1); bias: (c_out,)
    """
    nt, c, h, w = x_nchw.shape
    assert nt % n_segment == 0
    n = nt // n_segment
    T = n_segment
    fold = c // fold_div
    two_fold = 2 * fold
    assert 0 < two_fold <= c, "need at least one shifted channel"
    hw = h * w
    c_out = weight.shape[0]

    cdtype = jnp.bfloat16 if use_bf16 else x_nchw.dtype
    out_dtype = cdtype if out_dtype is None else out_dtype

    # NCHW -> (N, T, C, HW): pure reshape, HW stays on lanes (no host transpose).
    x = x_nchw.reshape(n, T, c, hw).astype(cdtype)
    w2 = weight.reshape(c_out, c).astype(cdtype)     # dtype contract: weights match x
    b2 = bias.reshape(c_out, 1).astype(jnp.float32)

    in_item = jnp.dtype(cdtype).itemsize
    out_item = jnp.dtype(out_dtype).itemsize

    # Generation-aware VMEM sizing (v7x: 64 MiB / TC; v5e/v6e: 128 MiB).
    vmem_cap = _vmem_capacity_bytes()
    w_bytes = c_out * c * in_item + c_out * 4
    lane_budget = max(1 << 20, min(int(0.30 * vmem_cap), 24 * 2 ** 20) - 2 * w_bytes)
    vmem_limit = min(int(0.70 * vmem_cap), 48 * 2 ** 20)

    # VMEM bytes per HW lane: double-buffered x and out blocks + staged/carry scratch.
    bytes_per_lane = (2 * c + c + two_fold) * in_item + 2 * c_out * out_item
    hw_tile = _pick_hw_tile(hw, bytes_per_lane, lane_budget)
    n_hw = pl.cdiv(hw, hw_tile)

    grid = (n, n_hw, T)                 # T innermost (reversed), carry lives across it

    out = pl.pallas_call(
        _make_tsm_conv_kernel(two_fold),
        out_shape=jax.ShapeDtypeStruct((n, T, c_out, hw), out_dtype),
        grid_spec=pltpu.PrefetchScalarGridSpec(
            num_scalar_prefetch=0,
            grid=grid,
            in_specs=[
                # full-channel tile of actual timestep t = T-1-t_rev
                pl.BlockSpec((1, 1, c, hw_tile),
                             lambda i, j, t: (i, T - 1 - t, 0, j)),
                # small resident weight / bias
                pl.BlockSpec((c_out, c), lambda i, j, t: (0, 0)),
                pl.BlockSpec((c_out, 1), lambda i, j, t: (0, 0)),
            ],
            out_specs=pl.BlockSpec((1, 1, c_out, hw_tile),
                                   lambda i, j, t: (i, T - 1 - t, 0, j)),
            scratch_shapes=[
                pltpu.VMEM((two_fold, hw_tile), cdtype),   # carry of leading channels
                pltpu.VMEM((c, hw_tile), cdtype),          # staged shifted operand
            ],
        ),
        compiler_params=pltpu.CompilerParams(
            dimension_semantics=("parallel", "parallel", "arbitrary"),
            vmem_limit_bytes=vmem_limit),
    )(x, w2, b2)

    # (N, T, Cout, HW) -> (nt, Cout, h, w): free reshape.
    return out.reshape(nt, c_out, h, w)


def _reference(x_nchw, weight, bias, *, n_segment=3, fold_div=8):
    """Plain-JAX reference mirroring the PyTorch module (non-inplace shift + 1x1 conv)."""
    nt, c, h, w = x_nchw.shape
    n = nt // n_segment
    xv = x_nchw.reshape(n, n_segment, c, h, w)
    fold = c // fold_div
    out = jnp.zeros_like(xv)
    out = out.at[:, :-1, :2 * fold].set(xv[:, 1:, :2 * fold])
    out = out.at[:, :, 2 * fold:].set(xv[:, :, 2 * fold:])
    out = out.reshape(nt, c, h, w)
    y = jnp.einsum("ncij,oc->noij", out, weight.reshape(weight.shape[0], c),
                   precision=jax.lax.Precision.HIGHEST)
    return y + bias[None, :, None, None]


if __name__ == "__main__":
    key = jax.random.PRNGKey(0)
    k_x, k_w, k_b, k_x2 = jax.random.split(key, 4)

    n_segment, fold_div = 3, 8
    n_batch, c, h, w = 2, 32, 16, 16
    nt = n_batch * n_segment

    x = jax.random.normal(k_x, (nt, c, h, w), dtype=jnp.float32)
    # net = Conv2d(c, c, kernel_size=1, bias=True), deterministic init
    weight = jax.random.normal(k_w, (c, c, 1, 1), dtype=jnp.float32) * 0.1
    bias = jax.random.normal(k_b, (c,), dtype=jnp.float32) * 0.1

    # f32 path
    y = jax.block_until_ready(
        temporal_shift_conv1x1(x, weight, bias, n_segment=n_segment, fold_div=fold_div))
    y_ref = _reference(x, weight, bias, n_segment=n_segment, fold_div=fold_div)
    assert y.shape == y_ref.shape == (nt, c, h, w)
    assert jnp.allclose(y, y_ref, atol=1e-4, rtol=1e-4), "f32 mismatch"

    # Non-128-multiple spatial size (14x14 = 196 lanes, typical TSM feature map):
    # exercises the full-width single-block path instead of a collapsed 128-lane tile.
    x2 = jax.random.normal(k_x2, (nt, c, 14, 14), dtype=jnp.float32)
    y2 = jax.block_until_ready(
        temporal_shift_conv1x1(x2, weight, bias, n_segment=n_segment, fold_div=fold_div))
    y2_ref = _reference(x2, weight, bias, n_segment=n_segment, fold_div=fold_div)
    assert jnp.allclose(y2, y2_ref, atol=1e-4, rtol=1e-4), "hw=196 mismatch"

    # bf16 operands AND bf16 output (f32 accumulation in-kernel); looser tolerance.
    y_bf16 = jax.block_until_ready(
        temporal_shift_conv1x1(x, weight, bias, n_segment=n_segment,
                               fold_div=fold_div, use_bf16=True))
    assert y_bf16.dtype == jnp.bfloat16
    assert jnp.allclose(y_bf16.astype(jnp.float32), y_ref,
                        atol=5e-2, rtol=5e-2), "bf16 mismatch"

    print("KERNEL_OK")
</pallas_src>

<mosaic_0001>
module attributes {stable_mosaic.version = 11 : i64} {
  func.func @kernel(%arg0: i32, %arg1: i32, %arg2: i32, %arg3: memref<1x1x32x256xf32, #tpu.memory_space<vmem>>, %arg4: memref<32x32xf32, #tpu.memory_space<vmem>>, %arg5: memref<32x1xf32, #tpu.memory_space<vmem>>, %arg6: memref<1x1x32x256xf32, #tpu.memory_space<vmem>>, %arg7: memref<8x256xf32, #tpu.memory_space<vmem>>, %arg8: memref<32x256xf32, #tpu.memory_space<vmem>>) attributes {dimension_semantics = [#tpu.dimension_semantics<parallel>, #tpu.dimension_semantics<parallel>, #tpu.dimension_semantics<arbitrary>], iteration_bounds = array<i64: 2, 1, 3>, scalar_prefetch = 0 : i64, scratch_operands = 2 : i64, tpu.core_type = #tpu.core_type<tc>, window_params = [{transform_indices = @transform_0, window_bounds = array<i64: 1, 1, 32, 256>}, {pipeline_mode = #tpu.pipeline_mode<synchronous>, transform_indices = @transform_1, window_bounds = array<i64: 32, 32>}, {pipeline_mode = #tpu.pipeline_mode<synchronous>, transform_indices = @transform_2, window_bounds = array<i64: 32, 1>}, {transform_indices = @transform_3, window_bounds = array<i64: 1, 1, 32, 256>}]} {
    %c0_i32 = arith.constant 0 : i32
    %0 = arith.cmpi eq, %arg2, %c0_i32 : i32
    %1 = arith.extui %0 : i1 to i32
    %c0_i32_0 = arith.constant 0 : i32
    %2 = arith.cmpi ne, %1, %c0_i32_0 : i32
    scf.if %2 {
      %cst_26 = arith.constant 0.000000e+00 : f32
      %20 = vector.broadcast %cst_26 : f32 to vector<8x256xf32>
      %c0_27 = arith.constant 0 : index
      %c0_28 = arith.constant 0 : index
      %21 = vector.load %arg7[%c0_27, %c0_28] : memref<8x256xf32, #tpu.memory_space<vmem>>, vector<8x256xf32>
      tpu.vector_store %arg7[%c0_27, %c0_28], %20 {strides = array<i32>} : memref<8x256xf32, #tpu.memory_space<vmem>>, vector<8x256xf32>,
    } else {
    }
    %c0 = arith.constant 0 : index
    %c0_1 = arith.constant 0 : index
    %c0_2 = arith.constant 0 : index
    %c0_3 = arith.constant 0 : index
    %3 = vector.load %arg3[%c0, %c0_1, %c0_2, %c0_3] : memref<1x1x32x256xf32, #tpu.memory_space<vmem>>, vector<1x1x32x256xf32>
    %4 = vector.shape_cast %3 : vector<1x1x32x256xf32> to vector<32x256xf32>
    %c0_4 = arith.constant 0 : index
    %c0_5 = arith.constant 0 : index
    %5 = vector.load %arg8[%c0_4, %c0_5] : memref<32x256xf32, #tpu.memory_space<vmem>>, vector<32x256xf32>
    tpu.vector_store %arg8[%c0_4, %c0_5], %4 {strides = array<i32>} : memref<32x256xf32, #tpu.memory_space<vmem>>, vector<32x256xf32>,
    %c0_6 = arith.constant 0 : index
    %c0_7 = arith.constant 0 : index
    %6 = vector.load %arg7[%c0_6, %c0_7] : memref<8x256xf32, #tpu.memory_space<vmem>>, vector<8x256xf32>
    %c0_8 = arith.constant 0 : index
    %c0_9 = arith.constant 0 : index
    %7 = vector.load %arg8[%c0_8, %c0_9] : memref<32x256xf32, #tpu.memory_space<vmem>>, vector<8x256xf32>
    tpu.vector_store %arg8[%c0_8, %c0_9], %6 {strides = array<i32>} : memref<32x256xf32, #tpu.memory_space<vmem>>, vector<8x256xf32>,
    %c0_10 = arith.constant 0 : index
    %c0_11 = arith.constant 0 : index
    %c0_12 = arith.constant 0 : index
    %c0_13 = arith.constant 0 : index
    %8 = vector.load %arg3[%c0_10, %c0_11, %c0_12, %c0_13] : memref<1x1x32x256xf32, #tpu.memory_space<vmem>>, vector<1x1x8x256xf32>
    %9 = vector.shape_cast %8 : vector<1x1x8x256xf32> to vector<8x256xf32>
    %c0_14 = arith.constant 0 : index
    %c0_15 = arith.constant 0 : index
    %10 = vector.load %arg7[%c0_14, %c0_15] : memref<8x256xf32, #tpu.memory_space<vmem>>, vector<8x256xf32>
    tpu.vector_store %arg7[%c0_14, %c0_15], %9 {strides = array<i32>} : memref<8x256xf32, #tpu.memory_space<vmem>>, vector<8x256xf32>,
    %c0_16 = arith.constant 0 : index
    %c0_17 = arith.constant 0 : index
    %11 = vector.load %arg4[%c0_16, %c0_17] : memref<32x32xf32, #tpu.memory_space<vmem>>, vector<32x32xf32>
    %c0_18 = arith.constant 0 : index
    %c0_19 = arith.constant 0 : index
    %12 = vector.load %arg8[%c0_18, %c0_19] : memref<32x256xf32, #tpu.memory_space<vmem>>, vector<32x256xf32>
    %cst = arith.constant dense<0.000000e+00> : vector<32x256xf32>
    %13 = tpu.matmul %11, %12, %cst {dimension_numbers = #tpu.dot_dimension_numbers<[1], [0], [0], [1], [0, 0, 1, 1], [], []>} : vector<32x32xf32>, vector<32x256xf32>, vector<32x256xf32> -> vector<32x256xf32>
    %c0_20 = arith.constant 0 : index
    %c0_21 = arith.constant 0 : index
    %14 = vector.load %arg5[%c0_20, %c0_21] : memref<32x1xf32, #tpu.memory_space<vmem>>, vector<32x1xf32>
    %15 = vector.broadcast %14 : vector<32x1xf32> to vector<32x256xf32>
    %16 = arith.addf %13, %15 : vector<32x256xf32>
    %c0_22 = arith.constant 0 : index
    %c0_23 = arith.constant 0 : index
    %c0_24 = arith.constant 0 : index
    %c0_25 = arith.constant 0 : index
    %17 = vector.load %arg6[%c0_22, %c0_23, %c0_24, %c0_25] : memref<1x1x32x256xf32, #tpu.memory_space<vmem>>, vector<1x1x32x256xf32>
    %18 = vector.shape_cast %17 : vector<1x1x32x256xf32> to vector<32x256xf32>
    %19 = vector.shape_cast %16 : vector<32x256xf32> to vector<1x1x32x256xf32>
    tpu.vector_store %arg6[%c0_22, %c0_23, %c0_24, %c0_25], %19 {strides = array<i32>} : memref<1x1x32x256xf32, #tpu.memory_space<vmem>>, vector<1x1x32x256xf32>,
    return
  }
  func.func @transform_0(%arg0: i32, %arg1: i32, %arg2: i32) -> (i32, i32, i32, i32) {
    %c2_i32 = arith.constant 2 : i32
    %0 = arith.subi %c2_i32, %arg2 : i32
    %c0_i32 = arith.constant 0 : i32
    %c0_i32_0 = arith.constant 0 : i32
    return %arg0, %0, %c0_i32, %arg1 : i32, i32, i32, i32
  }
  func.func @transform_1(%arg0: i32, %arg1: i32, %arg2: i32) -> (i32, i32) {
    %c0_i32 = arith.constant 0 : i32
    %c0_i32_0 = arith.constant 0 : i32
    %c0_i32_1 = arith.constant 0 : i32
    return %c0_i32, %c0_i32_0 : i32, i32
  }
  func.func @transform_2(%arg0: i32, %arg1: i32, %arg2: i32) -> (i32, i32) {
    %c0_i32 = arith.constant 0 : i32
    %c0_i32_0 = arith.constant 0 : i32
    %c0_i32_1 = arith.constant 0 : i32
    return %c0_i32, %c0_i32_0 : i32, i32
  }
  func.func @transform_3(%arg0: i32, %arg1: i32, %arg2: i32) -> (i32, i32, i32, i32) {
    %c2_i32 = arith.constant 2 : i32
    %0 = arith.subi %c2_i32, %arg2 : i32
    %c0_i32 = arith.constant 0 : i32
    %c0_i32_0 = arith.constant 0 : i32
    return %arg0, %0, %c0_i32, %arg1 : i32, i32, i32, i32
  }
}

</mosaic_0001>

<bundles_post_ra>
// kernel: tpu_custom_call.1
= control target key start
LH: loop header
LB: loop body
LE: loop exit
PB: predicated region body
PF: predicated region fallthrough
CT: control target
= control target key end

     0   :  { %8 = vsyncpa [#allocation5], 0  ;;  %s1047_s0 = inlined_call_operand.hbm [shape: f32[2,3,32,256], index: 0, kind: input, shape index: {}]   ;;  %s1048_s1 = inlined_call_operand.vmem [shape: f32[32,32], index: 1, kind: input, shape index: {}]   ;;  %s1049_s2 = inlined_call_operand.vmem [shape: f32[32,1], index: 2, kind: input, shape index: {}]   ;;  %s1050_s3 = inlined_call_operand.hbm [shape: f32[2,3,32,256], index: 3, kind: output, shape index: {}]  }
   0x1   :  { %10 = vsyncpa [#allocation5 + $0x1], 0 }
   0x2   :  { %11 = vsyncpa [#allocation6], 0 }
   0x3   :  { %13 = vsyncpa [#allocation6 + $0x1], 0  ;;  %s801_s12 = smov 0   ;;  %s803_s13 = smov 0  }
   0x4   :  { %s805_s14 = smov 0   ;;  %s807_s15 = smov 0  }
   0x5   :  { %s809_s16 = smov 0   ;;  %s811_s17 = smov 0  }
   0x6   :  { %s813_s18 = smov 0   ;;  %s815_s19 = smov 0  }
   0x7 LB: > { %s521_s20 = sadd.s32 4294967295, %s770_s19   ;;  %s522_s21 = sadd.s32 4294967294, %s770_s19   ;;  %s770_s19 = sphi %s815_s19, %s19_s19   ;;  %s766_s18 = sphi %s813_s18, %s1068_s18   ;;  %s762_s17 = sphi %s811_s17, %s1067_s17   ;;  %s758_s16 = sphi %s809_s16, %s1066_s16   ;;  %s754_s15 = sphi %s807_s15, %s1065_s15   ;;  %s750_s14 = sphi %s805_s14, %s1064_s14   ;;  %s746_s13 = sphi %s803_s13, %s1063_s13   ;;  %s742_s12 = sphi %s801_s12, %s1062_s12  }
   0x8   : > { %s31_s22 = sadd.s32 1, %s762_s17  ;;  %s38_s23 = sadd.s32 1, %s766_s18 }
   0x9   : > { %p32_p0 = scmp.ge.s32.totalorder %s31_s22, 3  ;;  %s42_s24 = ssub.s32 2, %s762_s17 }
   0xa   : > { %s51_s25 = sadd.s32 1, %s750_s14  ;;  %p58_p1 = scmp.ne.s32.totalorder %s750_s14, %s746_s13 }
   0xb   : > { %s1070_s22 = smov (%p32_p0, %s31_s22), 0  ;;  %s1072_s23 = smov (!%p32_p0, %s38_s23), %s766_s18 }
   0xc   : > { %s43_s26 = ssub.s32 2, %s1070_s22  ;;  %p59_p2 = scmp.eq.s32.totalorder %s770_s19, 0 }
   0xd   : > { %p40_p3 = scmp.ge.s32.totalorder %s1072_s23, 2  ;;  %s45_s27 = ssub.s32 %s42_s24, %s43_s26 }
   0xe   : > { %p857_p4 = por %p59_p2, %p58_p1  ;;  %p64_p5 = scmp.ne.s32.totalorder %s746_s13, %s742_s12 }
   0xf   : > { %s1074_s23 = smov (%p40_p3, %s1072_s23), 0  ;;  %p65_p6 = scmp.eq.s32.totalorder %s521_s20, 0 }
  0x10   : > { %1054 = sst [smem:[#allocation10_spill]] %s1074_s23  ;;  %p136_p7 = scmp.eq.s32.totalorder %s521_s20, 5 }
  0x11   : > { %s44_s29 = ssub.s32 %s766_s18, %s1074_s23  ;;  %p142_p8 = scmp.eq.s32.totalorder %s522_s21, 5 }
  0x12   : > { %s46_s30 = sor.u32 %s45_s27, %s44_s29  ;;  %p867_p9 = por %p65_p6, %p64_p5 }
  0x13   : > { %p49_p10 = scmp.eq.s32.totalorder %s46_s30, 0  ;;  %p874_p11 = por %p136_p7, %p58_p1 }
  0x14   : > { %p878_p12 = por %p142_p8, %p64_p5  ;;  %p567_p13 = scmp.lt.s32.totalorder %s770_s19, 6 }
  0x15   : > { %s1056_s5 = scalar_select %p874_p11, 1, 0 }
  0x16   : > { %s1057_s6 = scalar_select %p878_p12, 1, 0 }
  0x17   : > { %s883_s7 = scalar_select %p49_p10, %s750_s14, %s51_s25  }
  0x18   : > { %s168_s8 = sand.u32 1, %s750_s14   ;;  %s526_s10 = sshll.u32 %s42_s24, 3 }
  0x19   : > { %s525_s9 = sshll.u32 %s168_s8, 6  ;;  %s553_s11 = smul.u32 24, %s766_s18 }
  0x1a   : > { %s172_s20 = scalar_lea.vmem [#allocation4], %s525_s9  ;;  %p892_p0 = pnand %p567_p13, %p857_p4 }
  0x1b   : > { %s184_s21 = sshll.u32 %s172_s20, 4  ;;  %s181_s27 = sadd.s32 %s553_s11, %s526_s10  ;;  %s888_s21 = int_to_ptr.vmem [resolvable:$true] %s184_s21 }
  0x1c   : > { %s527_s29 = sshll.u32 %s181_s27, 7  ;;  %s901_s24 = scalar_lea.sflag [#allocation5], %s168_s8 }
  0x1d   : > { %s899_s23 = scalar_lea.hbm %s1047_s0, %s527_s29  ;;  %p644_p2 = pneg %p892_p0 }
  0x1e   : > { %s642_s28 = scalar_lea.hbm %s899_s23, 1024  ;;  %s647_s11 = scalar_lea.hbm %s1047_s0, 6144 }
  0x1f   : > { %p643_p1 = scmp.ne.s32.totalorder %s899_s23, %s642_s28  ;;  %p648_p5 = scmp.lt.u32.totalorder %s899_s23, %s1047_s0 }
  0x20   : > { %p649_p6 = scmp.lt.u32.totalorder %s647_s11, %s642_s28  ;;  %p651_p8 = scmp.lt.u32.totalorder %s642_s28, %s899_s23 }
  0x21   : > { %p645_p3 = pnand %p644_p2, %p643_p1 }
  0x22   : > { %p650_p7 = por %p649_p6, %p648_p5 }
  0x23   : > { %p646_p4 = pneg %p645_p3 }
  0x24   : > { %p652_p10 = por %p651_p8, %p650_p7 }
  0x26   : > { %p653_p13 = pnand %p652_p10, %p646_p4 }
  0x28   : > { %656 = shalt.err (!%p653_p13)
}
  0x29   : > { %s657_s8 = scalar_lea.vmem %s888_s21, 1024  ;;  %s772_s29 = smov [#allocation4]  }
  0x2a   : > { %p658_p1 = scmp.ne.s32.totalorder %s888_s21, %s657_s8  ;;  %s662_s25 = sshll.u32 %s772_s29, 4  ;;  %s663_s25 = int_to_ptr.vmem [resolvable:$false] %s662_s25 }
  0x2b   : > { %s664_s30 = scalar_lea.vmem %s663_s25, 2048  ;;  %p665_p11 = scmp.lt.s32.totalorder %s888_s21, %s663_s25 }
  0x2c   : > { %p660_p3 = pnand %p658_p1, %p644_p2  ;;  %p666_p5 = scmp.lt.s32.totalorder %s664_s30, %s657_s8 }
  0x2e   : > { %p661_p12 = pneg %p660_p3  ;;  %p667_p6 = por %p666_p5, %p665_p11 }
  0x30   : > { %p668_p7 = pnand %p667_p6, %p661_p12 }
  0x32   : > { %671 = shalt.err (!%p668_p7)
}
  0x33   : > { %s773_s28 = smov 256   ;;  %s774_s9 = smov 16  }
  0x34   : > { %562 = dma.hbm_to_vmem [thread:$0]  (!%p892_p0), %s899_s23, 1024, %s888_s21, %s901_s24, %s773_s28, %s773_s28, %s774_s9  }
  0x35   : > { %p528_p2 = scmp.ge.s32.totalorder %s770_s19, 1  ;;  %p192_p4 = scmp.lt.s32.totalorder %s770_s19, 7 }
  0x37   : > { %p193_p8 = pnand %p528_p2, %p192_p4 }
  0x38   : > { %s932_s10 = sand.u32 (!%p193_p8), 1, %s746_s13  }
  0x39   : > { %196 = sbr.rel (%p193_p8) target bundleno = 320 (0x140), region = 32  ;;  %s529_s11 = sshll.u32 (!%p193_p8), %s932_s10, 6 }
  0x3a   : > { %s199_s20 = scalar_lea.sflag (!%p193_p8), [#allocation5], %s932_s10  ;;  %s936_s27 = scalar_lea.vmem (!%p193_p8), [#allocation4], %s529_s11 }
  0x40   : > { %733 = dma.done.wait (%p867_p9), %s199_s20, 1024  }
  0x41   : > { %735 = vsyncadd (%p867_p9), %s199_s20, 4294966272  ;;  %s942_s23 = scalar_lea.vmem [#allocation7], %s529_s11  ;;  %p531_p11 = scmp.ne.s32.totalorder %s754_s15, 0 }
  0x42   : > { %v775_v0 = vmov (!%p531_p11), 0.0  }
  0x43   : > { %232 = sbr.rel (%p531_p11) target bundleno = 74 (0x4a), region = 40  ;;  %233 = vst [vmem:[#allocation2] sm:$0xff] (!%p531_p11), %v775_v0  ;;  %234 = vst [vmem:[#allocation2 + $0x8] sm:$0xff] (!%p531_p11), %v775_v0 }
  0x4a PF: > { %v238_v1 = vld [vmem:[%s936_s27 + $0x18] sm:$0xff]  ;;  %v256_v3 = vld [vmem:[%s936_s27 + $0x8] sm:$0xff]  ;;  %v237_v5 = vld [vmem:[%s936_s27 + $0x10] sm:$0xff]  ;;  %v776_v8 = vmov 0.0   ;;  %v777_v13 = vmov 0   ;;  %vm295_vm0 = vcmask 261120  }
  0x4b   : > { %v252_v2 = vld [vmem:[#allocation2 + $0x8] sm:$0xff]  ;;  %v251_v6 = vld [vmem:[#allocation2] sm:$0xff]  ;;  %v255_v7 = vld [vmem:[%s936_s27] sm:$0xff]  ;;  %372 = vmatprep.mubr.f32.mxu0 %v776_v8  ;;  %384 = vmatprep.mubr.f32.mxu1 %v776_v8  ;;  %s413_s24 = ssub.s32 2, %s754_s15  ;;  %s554_s8 = smul.u32 24, %s758_s16 }
  0x4c   : > { %258 = vst [vmem:[#allocation2 + $0x8] sm:$0xff] %v256_v3  ;;  %v541_v4 = vpack.c.bf16 %v238_v1, %v252_v2  ;;  %257 = vst [vmem:[#allocation2] sm:$0xff] %v255_v7  ;;  %v543_v9 = vpack.c.bf16 %v237_v5, %v251_v6  ;;  %v240_v10 = vld [vmem:[%s936_s27 + $0x28] sm:$0xff]  ;;  %v242_v11 = vld [vmem:[%s936_s27 + $0x38] sm:$0xff]  ;;  %641 = vset.pattern.permute.xlu1 %v777_v13  ;;  %640 = vset.pattern.permute.xlu0 %v777_v13  ;;  %s537_s29 = sshll.u32 %s413_s24, 3  ;;  %s424_s28 = sshll.u32 %s942_s23, 4  ;;  %s989_s28 = int_to_ptr.vmem [resolvable:$true] %s424_s28 }
  0x4d   : > { %v239_v12 = vld [vmem:[%s936_s27 + $0x20] sm:$0xff]  ;;  %v545_v14 = vpack.c.bf16 %v242_v11, %v240_v10  ;;  %v241_v15 = vld [vmem:[%s936_s27 + $0x30] sm:$0xff]  ;;  %v274_v19 = vld [vmem:[%s1049_s2 + $0x18] sm:$0xff]  ;;  %s421_s25 = sadd.s32 %s554_s8, %s537_s29  ;;  %s406_s11 = scalar_lea.sflag [#allocation6], %s932_s10 }
  0x4e   : > { %542 = vmatprep.subr.bf16.mxu0 %v541_v4  ;;  %549 = vmatprep.subr.bf16.mxu1 %v541_v4  ;;  %v547_v16 = vpack.c.bf16 %v241_v15, %v239_v12  ;;  %v273_v17 = vld [vmem:[%s1049_s2 + $0x10] sm:$0xff]  ;;  %v271_v18 = vld [vmem:[%s1049_s2] sm:$0xff]  ;;  %v272_v20 = vld [vmem:[%s1049_s2 + $0x8] sm:$0xff]  ;;  %s538_s30 = sshll.u32 %s421_s25, 7  ;;  %s672_s20 = scalar_lea.vmem %s989_s28, 1024 }
  0x4f   : > { %544 = vmatpush1.bf16.msra.mxu0 %v543_v9  ;;  %551 = vmatpush1.bf16.msra.mxu1 %v543_v9  ;;  %v259_v21 = vld [vmem:[%s1048_s1] sm:$0xff]  ;;  %v261_v22 = vld [vmem:[%s1048_s1 + $0x10] sm:$0xff]  ;;  %v260_v23 = vld [vmem:[%s1048_s1 + $0x8] sm:$0xff]  ;;  %s987_s9 = scalar_lea.hbm %s1050_s3, %s538_s30  ;;  %p673_p9 = scmp.ne.s32.totalorder %s989_s28, %s672_s20 }
  0x50   : > { %546 = vmatprep.subr.bf16.mxu0 %v545_v14  ;;  %550 = vmatprep.subr.bf16.mxu1 %v545_v14  ;;  %v262_v24 = vld [vmem:[%s1048_s1 + $0x18] sm:$0xff]  ;;  %p1059_p12 = scmp.ne.s32.totalorder %s1056_s5, 0  ;;  %s778_s27 = smov [#allocation7]  }
  0x51   : > { %287 = vperm.xlu1 %641, %v273_v17   ;;  %277 = vperm.xlu0 %640, %v271_v18   ;;  %s676_s4 = sshll.u32 %s778_s27, 4  ;;  %s677_s4 = int_to_ptr.vmem [resolvable:$false] %s676_s4 }
  0x52   : > { %p674_p0 = pnand %p673_p9, %p1059_p12  ;;  %s678_s21 = scalar_lea.vmem %s677_s4, 2048 }
  0x53   : > { %548 = vmatpush1.bf16.msra.mxu0 %v547_v16  ;;  %552 = vmatpush1.bf16.msra.mxu1 %v547_v16  ;;  %p679_p13 = scmp.lt.s32.totalorder %s989_s28, %s677_s4  ;;  %p680_p1 = scmp.lt.s32.totalorder %s678_s21, %s672_s20 }
  0x54   : > { %p675_p10 = pneg %p674_p0 }
  0x55   : > { %292 = vperm.xlu1 %641, %v274_v19   ;;  %282 = vperm.xlu0 %640, %v272_v20   ;;  %p681_p3 = por %p680_p1, %p679_p13 }
  0x56   : > { %532 = vmatmul.mubr.msk.f32.vlgmr.msra.gmra.mrb[0].mxu0 %vm295_vm0, %v259_v21  ;;  %534 = vmatmul.mubr.msk.f32.vlgmr.msra.gmra.mrb[0].mxu1 %vm295_vm0, %v261_v22 }
  0x57   : > { %378 = vmatprep.mubr.f32.mxu0 %v776_v8  ;;  %390 = vmatprep.mubr.f32.mxu1 %v776_v8  ;;  %p682_p5 = pnand %p681_p3, %p675_p10 }
  0x5a   : > { %533 = vmatmul.mubr.msk.f32.gmra.mrb[2].mxu0 %vm295_vm0, %v260_v23  ;;  %535 = vmatmul.mubr.msk.f32.gmra.mrb[2].mxu1 %vm295_vm0, %v262_v24 }
  0xd0   : > { %v288_v25 = vpop.permute.xlu1 %287  ;;  %v278_v26 = vpop.permute.xlu0 %277 }
  0xd4   : > { %v293_v35 = vpop.permute.xlu1 %292  ;;  %v283_v36 = vpop.permute.xlu0 %282 }
 0x129   : > { %v374_v27 = vpop.f32.mrb[0].mxu0  ;;  %v386_v28 = vpop.f32.mrb[0].mxu1 }
 0x12a   : > { %v375_v29 = vadd.f32 %v374_v27, %v278_v26  ;;  %v387_v30 = vadd.f32 %v386_v28, %v288_v25  ;;  %v376_v31 = vpop.f32.mrb[1].mxu0  ;;  %v388_v32 = vpop.f32.mrb[1].mxu1 }
 0x12b   : > { %v377_v33 = vadd.f32 %v376_v31, %v278_v26  ;;  %v389_v34 = vadd.f32 %v388_v32, %v288_v25 }
 0x12c   : > { %397 = vst [vmem:[%s942_s23] sm:$0xff] %v375_v29  ;;  %401 = vst [vmem:[%s942_s23 + $0x20] sm:$0xff] %v387_v30 }
 0x12d   : > { %398 = vst [vmem:[%s942_s23 + $0x8] sm:$0xff] %v377_v33  ;;  %402 = vst [vmem:[%s942_s23 + $0x28] sm:$0xff] %v389_v34  ;;  %v380_v37 = vpop.f32.mrb[2].mxu0  ;;  %v392_v38 = vpop.f32.mrb[2].mxu1 }
 0x12e   : > { %v381_v39 = vadd.f32 %v380_v37, %v283_v36  ;;  %v393_v40 = vadd.f32 %v392_v38, %v293_v35  ;;  %v382_v41 = vpop.f32.mrb[3].mxu0  ;;  %v394_v42 = vpop.f32.mrb[3].mxu1 }
 0x12f   : > { %v383_v43 = vadd.f32 %v382_v41, %v283_v36  ;;  %v395_v44 = vadd.f32 %v394_v42, %v293_v35 }
 0x130   : > { %399 = vst [vmem:[%s942_s23 + $0x10] sm:$0xff] %v381_v39  ;;  %403 = vst [vmem:[%s942_s23 + $0x30] sm:$0xff] %v393_v40 }
 0x131   : > { %400 = vst [vmem:[%s942_s23 + $0x18] sm:$0xff] %v383_v43  ;;  %404 = vst [vmem:[%s942_s23 + $0x38] sm:$0xff] %v395_v44 }
 0x132   : > { %685 = shalt.err (!%p682_p5)
}
 0x133   : > { %s686_s23 = scalar_lea.hbm %s987_s9, 1024  ;;  %s690_s8 = scalar_lea.hbm %s1050_s3, 6144 }
 0x134   : > { %p687_p6 = scmp.ne.s32.totalorder %s987_s9, %s686_s23  ;;  %p691_p4 = scmp.lt.u32.totalorder %s987_s9, %s1050_s3 }
 0x135   : > { %p692_p8 = scmp.lt.u32.totalorder %s690_s8, %s686_s23  ;;  %p694_p9 = scmp.lt.u32.totalorder %s686_s23, %s987_s9 }
 0x136   : > { %p688_p7 = pnand %p687_p6, %p1059_p12 }
 0x137   : > { %p693_p11 = por %p692_p8, %p691_p4 }
 0x138   : > { %p689_p2 = pneg %p688_p7 }
 0x139   : > { %p695_p0 = por %p694_p9, %p693_p11 }
 0x13b   : > { %p696_p10 = pnand %p695_p0, %p689_p2 }
 0x13d   : > { %699 = shalt.err (!%p696_p10)
}
 0x13e   : > { %s779_s30 = smov 256   ;;  %s780_s15 = smov 16  }
 0x13f   : > { %557 = dma.vmem_to_hbm [thread:$0]  (%p1059_p12), %s989_s28, 1024, %s987_s9, %s406_s11, %s779_s30, %s779_s30, %s780_s15  }
 0x140 PF: > { %p568_p13 = scmp.ge.s32.totalorder %s770_s19, 2  ;;  %s439_s16 = sand.u32 1, %s742_s12  }
 0x141   : > { %p1060_p1 = scmp.ne.s32.totalorder %s1057_s6, 0  ;;  %s440_s20 = scalar_lea.sflag [#allocation6], %s439_s16 }
 0x143   : > { %p564_p3 = pnand %p568_p13, %p1060_p1 }
 0x145   : > { %737 = dma.done.wait (!%p564_p3), %s440_s20, 1024  }
 0x146   : > { %739 = vsyncadd (!%p564_p3), %s440_s20, 4294966272  ;;  %s19_s19 = sadd.s32 1, %s770_s19   ;;  %s1061_s5 = sld [smem:[#allocation10_spill]] }
 0x147   : > { %p16_p5 = scmp.ge.s32.totalorder %s19_s19, 8   ;;  %s1062_s12 = smov %s746_s13 }
 0x148   : > { %s1063_s13 = smov %s750_s14  ;;  %s1064_s14 = smov %s883_s7 }
 0x149   : > { %s1065_s15 = smov %s762_s17  ;;  %s1066_s16 = smov %s766_s18 }
 0x14a   : > { %s1067_s17 = smov %s1070_s22  ;;  %18 = sbr.rel (!%p16_p5) target bundleno = 7 (0x7), region = 81 }
 0x14c   : > { %s1068_s18 = smov %s1061_s5 }
 0x151   :  { %445 = vsyncpa [#allocation5], 1 }
 0x152   :  { %447 = vsyncpa [#allocation5 + $0x1], 1 }
 0x153   :  { %448 = vsyncpa [#allocation6], 1 }
 0x154   :  { %450 = vsyncpa [#allocation6 + $0x1], 1 }

</bundles_post_ra>
